<compile_context>
chip_gen: v7x
topology: tpu7x:2x2x1
jax: 0.10.0
libtpu: 0.0.40
codegen_flags: <defaults>
</compile_context>

<pallas_src>
import functools

import jax
import jax.numpy as jnp
from jax.experimental import pallas as pl
from jax.experimental.pallas import tpu as pltpu


def _round_up(n: int, m: int) -> int:
    return ((n + m - 1) // m) * m


# -----------------------------------------------------------------------------
# Kernel: one batch tile. 3 MXU matmuls (layer 3 augmented with a logdet
# column), ReLU / exp / scale-shift on the VPU, full-width z store. All f32.
# -----------------------------------------------------------------------------
def _affine_coupling_kernel(x_ref, w1_ref, b1_ref, w2_ref, b2_ref,
                            w3_ref, b3_ref, z_ref, logdet_ref, *, split, out):
    x = x_ref[...]                      # (tb, D) f32 — one vreg wide (D=16)
    x_a = x[:, :split]                  # static in-vreg lane slice (no relayout)
    x_b = x[:, split:]

    # Conditioner net: Linear -> ReLU -> Linear -> ReLU -> Linear (f32 MXU acc).
    h = jnp.dot(x_a, w1_ref[...], preferred_element_type=jnp.float32) + b1_ref[...]
    h = jnp.maximum(h, 0.0)
    h = jnp.dot(h, w2_ref[...], preferred_element_type=jnp.float32) + b2_ref[...]
    h = jnp.maximum(h, 0.0)

    # Layer 3 (augmented): params = [log_scale (out) | shift (out) | logdet (1)]
    # — the last column of w3 holds the row-sums of the log_scale block, so the
    # logdet reduction comes straight out of the matmul (no XLU reduce).
    params = jnp.dot(h, w3_ref[...], preferred_element_type=jnp.float32) + b3_ref[...]
    log_scale = params[:, :out]
    shift = params[:, out:2 * out]

    z_b = x_b * jnp.exp(log_scale) + shift
    # Full (tb, D) store: x_a passed through + transformed x_b.
    z_ref[...] = jnp.concatenate([x_a, z_b], axis=1).astype(z_ref.dtype)
    logdet_ref[...] = params[:, 2 * out:]


# -----------------------------------------------------------------------------
# Wrapper
# -----------------------------------------------------------------------------
def affine_coupling_forward(x, w1, b1, w2, b2, w3, b3, *, tb=None):
    """Pallas implementation of AffineCoupling.forward.

    x : (B, D) float32
    w1: (split, H)   b1: (H,)
    w2: (H, H)       b2: (H,)
    w3: (H, 2*(D-split))   b3: (2*(D-split),)
    tb: batch tile size (rows per grid step); auto if None.
    Returns (z, log_det_jac) with shapes (B, D) and (B,).
    """
    B, D = x.shape
    split = D // 2
    out = D - split
    H = w1.shape[1]

    # Augment layer-3 weight/bias with one extra column = row-sums of the
    # log_scale half, so sum(log_scale, axis=1) falls out of the MXU.
    w3_aug = jnp.concatenate([w3, jnp.sum(w3[:, :out], axis=1, keepdims=True)],
                             axis=1)                       # (H, 2*out + 1)
    b3_aug = jnp.concatenate([b3, jnp.sum(b3[:out])[None]]).reshape(1, -1)

    # Batch tile: large enough to amortize the ~0.35 us per-grid-step overhead,
    # but capped so there are >= 2 parallel grid steps when B allows (v7x has
    # two TensorCores sharding the "parallel" axis). Sublane-aligned (x8).
    if tb is None:
        tb = min(4096, max(8, _round_up(pl.cdiv(B, 2), 8)))
    tb = max(8, _round_up(tb, 8))
    grid = (pl.cdiv(B, tb),)            # no padding: ragged last block is fine;
                                        # OOB rows are discarded on write.

    kernel = functools.partial(_affine_coupling_kernel, split=split, out=out)

    def const_spec(shape):
        # Constant index_map: DMA'd once, resident across all batch tiles.
        return pl.BlockSpec(shape, lambda i: (0, 0))

    z, logdet = pl.pallas_call(
        kernel,
        out_shape=(jax.ShapeDtypeStruct((B, D), x.dtype),
                   jax.ShapeDtypeStruct((B, 1), jnp.float32)),
        grid=grid,
        in_specs=[
            pl.BlockSpec((tb, D), lambda i: (i, 0)),   # x (full rows)
            const_spec((split, H)),                    # w1
            const_spec((1, H)),                        # b1
            const_spec((H, H)),                        # w2
            const_spec((1, H)),                        # b2
            const_spec((H, 2 * out + 1)),              # w3 (augmented)
            const_spec((1, 2 * out + 1)),              # b3 (augmented)
        ],
        out_specs=(pl.BlockSpec((tb, D), lambda i: (i, 0)),
                   pl.BlockSpec((tb, 1), lambda i: (i, 0))),
        compiler_params=pltpu.CompilerParams(
            dimension_semantics=("parallel",)),
    )(x, w1, b1.reshape(1, -1), w2, b2.reshape(1, -1), w3_aug, b3_aug)

    return z, logdet[:, 0]


# -----------------------------------------------------------------------------
# Pure-JAX reference (mirrors the PyTorch forward exactly), for verification.
# -----------------------------------------------------------------------------
def affine_coupling_ref(x, w1, b1, w2, b2, w3, b3):
    D = x.shape[1]
    split = D // 2
    out = D - split
    x_a, x_b = x[:, :split], x[:, split:]
    h = jnp.maximum(x_a @ w1 + b1, 0.0)
    h = jnp.maximum(h @ w2 + b2, 0.0)
    params = h @ w3 + b3
    log_scale, shift = params[:, :out], params[:, out:]
    z_b = x_b * jnp.exp(log_scale) + shift
    z = jnp.concatenate([x_a, z_b], axis=1)
    return z, jnp.sum(log_scale, axis=1)


if __name__ == "__main__":
    B, D, H = 8, 16, 32            # batch, input_dim, hidden_dim
    split = D // 2
    out = D - split

    key = jax.random.PRNGKey(0)
    kx, k1, k2, k3, k4, k5, k6 = jax.random.split(key, 7)

    x = jax.random.normal(kx, (B, D), dtype=jnp.float32)

    w1 = jax.random.normal(k1, (split, H), dtype=jnp.float32) * 0.1
    b1 = jax.random.normal(k2, (H,), dtype=jnp.float32) * 0.1
    w2 = jax.random.normal(k3, (H, H), dtype=jnp.float32) * 0.1
    b2 = jax.random.normal(k4, (H,), dtype=jnp.float32) * 0.1

    # Case 1: module's reset_parameters() zero-inits the last Linear -> identity.
    w3_zero = jnp.zeros((H, 2 * out), dtype=jnp.float32)
    b3_zero = jnp.zeros((2 * out,), dtype=jnp.float32)
    z0, ld0 = affine_coupling_forward(x, w1, b1, w2, b2, w3_zero, b3_zero)
    jax.block_until_ready((z0, ld0))
    z0_ref, ld0_ref = affine_coupling_ref(x, w1, b1, w2, b2, w3_zero, b3_zero)
    assert jnp.allclose(z0, z0_ref, atol=1e-5), "zero-init z mismatch"
    assert jnp.allclose(ld0, ld0_ref, atol=1e-5), "zero-init logdet mismatch"

    # Case 2: non-zero last layer — exercises exp/scale/shift and MXU-folded sum.
    w3 = jax.random.normal(k5, (H, 2 * out), dtype=jnp.float32) * 0.05
    b3 = jnp.linspace(-0.1, 0.1, 2 * out, dtype=jnp.float32)
    z, ld = affine_coupling_forward(x, w1, b1, w2, b2, w3, b3)
    jax.block_until_ready((z, ld))
    z_ref, ld_ref = affine_coupling_ref(x, w1, b1, w2, b2, w3, b3)
    assert jnp.allclose(z, z_ref, atol=1e-5, rtol=1e-5), "z mismatch"
    assert jnp.allclose(ld, ld_ref, atol=1e-5, rtol=1e-5), "logdet mismatch"

    # Case 3: larger, non-tile-divisible batch with a multi-step grid and a
    # ragged last block (exercises the no-padding edge-block path).
    B2 = 300
    x2 = jax.random.normal(k6, (B2, D), dtype=jnp.float32)
    z2, ld2 = affine_coupling_forward(x2, w1, b1, w2, b2, w3, b3, tb=128)
    jax.block_until_ready((z2, ld2))
    z2_ref, ld2_ref = affine_coupling_ref(x2, w1, b1, w2, b2, w3, b3)
    assert jnp.allclose(z2, z2_ref, atol=1e-5, rtol=1e-5), "gridded z mismatch"
    assert jnp.allclose(ld2, ld2_ref, atol=1e-5, rtol=1e-5), "gridded logdet mismatch"

    print("KERNEL_OK")
</pallas_src>

<mosaic_0001>
module attributes {stable_mosaic.version = 11 : i64} {
  func.func @_affine_coupling_kernel(%arg0: i32, %arg1: memref<8x16xf32, #tpu.memory_space<vmem>>, %arg2: memref<8x32xf32, #tpu.memory_space<vmem>>, %arg3: memref<1x32xf32, #tpu.memory_space<vmem>>, %arg4: memref<32x32xf32, #tpu.memory_space<vmem>>, %arg5: memref<1x32xf32, #tpu.memory_space<vmem>>, %arg6: memref<32x17xf32, #tpu.memory_space<vmem>>, %arg7: memref<1x17xf32, #tpu.memory_space<vmem>>, %arg8: memref<8x16xf32, #tpu.memory_space<vmem>>, %arg9: memref<8x1xf32, #tpu.memory_space<vmem>>) attributes {dimension_semantics = [#tpu.dimension_semantics<parallel>], iteration_bounds = array<i64: 1>, scalar_prefetch = 0 : i64, scratch_operands = 0 : i64, tpu.core_type = #tpu.core_type<tc>, window_params = [{transform_indices = @transform_0, window_bounds = array<i64: 8, 16>}, {pipeline_mode = #tpu.pipeline_mode<synchronous>, transform_indices = @transform_1, window_bounds = array<i64: 8, 32>}, {pipeline_mode = #tpu.pipeline_mode<synchronous>, transform_indices = @transform_2, window_bounds = array<i64: 1, 32>}, {pipeline_mode = #tpu.pipeline_mode<synchronous>, transform_indices = @transform_3, window_bounds = array<i64: 32, 32>}, {pipeline_mode = #tpu.pipeline_mode<synchronous>, transform_indices = @transform_4, window_bounds = array<i64: 1, 32>}, {pipeline_mode = #tpu.pipeline_mode<synchronous>, transform_indices = @transform_5, window_bounds = array<i64: 32, 17>}, {pipeline_mode = #tpu.pipeline_mode<synchronous>, transform_indices = @transform_6, window_bounds = array<i64: 1, 17>}, {transform_indices = @transform_7, window_bounds = array<i64: 8, 16>}, {transform_indices = @transform_8, window_bounds = array<i64: 8, 1>}]} {
    %c0 = arith.constant 0 : index
    %c0_0 = arith.constant 0 : index
    %0 = vector.load %arg1[%c0, %c0_0] : memref<8x16xf32, #tpu.memory_space<vmem>>, vector<8x16xf32>
    %1 = vector.extract_strided_slice %0 {offsets = [0, 0], sizes = [8, 8], strides = [1, 1]} : vector<8x16xf32> to vector<8x8xf32>
    %2 = vector.extract_strided_slice %0 {offsets = [0, 8], sizes = [8, 8], strides = [1, 1]} : vector<8x16xf32> to vector<8x8xf32>
    %c0_1 = arith.constant 0 : index
    %c0_2 = arith.constant 0 : index
    %3 = vector.load %arg2[%c0_1, %c0_2] : memref<8x32xf32, #tpu.memory_space<vmem>>, vector<8x32xf32>
    %cst = arith.constant dense<0.000000e+00> : vector<8x32xf32>
    %4 = tpu.matmul %1, %3, %cst {dimension_numbers = #tpu.dot_dimension_numbers<[1], [0], [0], [1], [0, 0, 1, 1], [], []>} : vector<8x8xf32>, vector<8x32xf32>, vector<8x32xf32> -> vector<8x32xf32>
    %c0_3 = arith.constant 0 : index
    %c0_4 = arith.constant 0 : index
    %5 = vector.load %arg3[%c0_3, %c0_4] : memref<1x32xf32, #tpu.memory_space<vmem>>, vector<1x32xf32>
    %6 = vector.broadcast %5 : vector<1x32xf32> to vector<8x32xf32>
    %7 = arith.addf %4, %6 : vector<8x32xf32>
    %cst_5 = arith.constant 0.000000e+00 : f32
    %8 = vector.broadcast %cst_5 : f32 to vector<8x32xf32>
    %9 = arith.maximumf %7, %8 : vector<8x32xf32>
    %c0_6 = arith.constant 0 : index
    %c0_7 = arith.constant 0 : index
    %10 = vector.load %arg4[%c0_6, %c0_7] : memref<32x32xf32, #tpu.memory_space<vmem>>, vector<32x32xf32>
    %cst_8 = arith.constant dense<0.000000e+00> : vector<8x32xf32>
    %11 = tpu.matmul %9, %10, %cst_8 {dimension_numbers = #tpu.dot_dimension_numbers<[1], [0], [0], [1], [0, 0, 1, 1], [], []>} : vector<8x32xf32>, vector<32x32xf32>, vector<8x32xf32> -> vector<8x32xf32>
    %c0_9 = arith.constant 0 : index
    %c0_10 = arith.constant 0 : index
    %12 = vector.load %arg5[%c0_9, %c0_10] : memref<1x32xf32, #tpu.memory_space<vmem>>, vector<1x32xf32>
    %13 = vector.broadcast %12 : vector<1x32xf32> to vector<8x32xf32>
    %14 = arith.addf %11, %13 : vector<8x32xf32>
    %cst_11 = arith.constant 0.000000e+00 : f32
    %15 = vector.broadcast %cst_11 : f32 to vector<8x32xf32>
    %16 = arith.maximumf %14, %15 : vector<8x32xf32>
    %c0_12 = arith.constant 0 : index
    %c0_13 = arith.constant 0 : index
    %17 = vector.load %arg6[%c0_12, %c0_13] : memref<32x17xf32, #tpu.memory_space<vmem>>, vector<32x17xf32>
    %cst_14 = arith.constant dense<0.000000e+00> : vector<8x17xf32>
    %18 = tpu.matmul %16, %17, %cst_14 {dimension_numbers = #tpu.dot_dimension_numbers<[1], [0], [0], [1], [0, 0, 1, 1], [], []>} : vector<8x32xf32>, vector<32x17xf32>, vector<8x17xf32> -> vector<8x17xf32>
    %c0_15 = arith.constant 0 : index
    %c0_16 = arith.constant 0 : index
    %19 = vector.load %arg7[%c0_15, %c0_16] : memref<1x17xf32, #tpu.memory_space<vmem>>, vector<1x17xf32>
    %20 = vector.broadcast %19 : vector<1x17xf32> to vector<8x17xf32>
    %21 = arith.addf %18, %20 : vector<8x17xf32>
    %22 = vector.extract_strided_slice %21 {offsets = [0, 0], sizes = [8, 8], strides = [1, 1]} : vector<8x17xf32> to vector<8x8xf32>
    %23 = vector.extract_strided_slice %21 {offsets = [0, 8], sizes = [8, 8], strides = [1, 1]} : vector<8x17xf32> to vector<8x8xf32>
    %24 = math.exp %22 : vector<8x8xf32>
    %25 = arith.mulf %2, %24 : vector<8x8xf32>
    %26 = arith.addf %25, %23 : vector<8x8xf32>
    %27 = tpu.concatenate %1, %26 in 1 : vector<8x8xf32>, vector<8x8xf32> -> vector<8x16xf32>
    %c0_17 = arith.constant 0 : index
    %c0_18 = arith.constant 0 : index
    %28 = vector.load %arg8[%c0_17, %c0_18] : memref<8x16xf32, #tpu.memory_space<vmem>>, vector<8x16xf32>
    tpu.vector_store %arg8[%c0_17, %c0_18], %27 {strides = array<i32>} : memref<8x16xf32, #tpu.memory_space<vmem>>, vector<8x16xf32>,
    %29 = vector.extract_strided_slice %21 {offsets = [0, 16], sizes = [8, 1], strides = [1, 1]} : vector<8x17xf32> to vector<8x1xf32>
    %c0_19 = arith.constant 0 : index
    %c0_20 = arith.constant 0 : index
    %30 = vector.load %arg9[%c0_19, %c0_20] : memref<8x1xf32, #tpu.memory_space<vmem>>, vector<8x1xf32>
    tpu.vector_store %arg9[%c0_19, %c0_20], %29 {strides = array<i32>} : memref<8x1xf32, #tpu.memory_space<vmem>>, vector<8x1xf32>,
    return
  }
  func.func @transform_0(%arg0: i32) -> (i32, i32) {
    %c0_i32 = arith.constant 0 : i32
    %c0_i32_0 = arith.constant 0 : i32
    return %arg0, %c0_i32 : i32, i32
  }
  func.func @transform_1(%arg0: i32) -> (i32, i32) {
    %c0_i32 = arith.constant 0 : i32
    %c0_i32_0 = arith.constant 0 : i32
    %c0_i32_1 = arith.constant 0 : i32
    return %c0_i32, %c0_i32_0 : i32, i32
  }
  func.func @transform_2(%arg0: i32) -> (i32, i32) {
    %c0_i32 = arith.constant 0 : i32
    %c0_i32_0 = arith.constant 0 : i32
    %c0_i32_1 = arith.constant 0 : i32
    return %c0_i32, %c0_i32_0 : i32, i32
  }
  func.func @transform_3(%arg0: i32) -> (i32, i32) {
    %c0_i32 = arith.constant 0 : i32
    %c0_i32_0 = arith.constant 0 : i32
    %c0_i32_1 = arith.constant 0 : i32
    return %c0_i32, %c0_i32_0 : i32, i32
  }
  func.func @transform_4(%arg0: i32) -> (i32, i32) {
    %c0_i32 = arith.constant 0 : i32
    %c0_i32_0 = arith.constant 0 : i32
    %c0_i32_1 = arith.constant 0 : i32
    return %c0_i32, %c0_i32_0 : i32, i32
  }
  func.func @transform_5(%arg0: i32) -> (i32, i32) {
    %c0_i32 = arith.constant 0 : i32
    %c0_i32_0 = arith.constant 0 : i32
    %c0_i32_1 = arith.constant 0 : i32
    return %c0_i32, %c0_i32_0 : i32, i32
  }
  func.func @transform_6(%arg0: i32) -> (i32, i32) {
    %c0_i32 = arith.constant 0 : i32
    %c0_i32_0 = arith.constant 0 : i32
    %c0_i32_1 = arith.constant 0 : i32
    return %c0_i32, %c0_i32_0 : i32, i32
  }
  func.func @transform_7(%arg0: i32) -> (i32, i32) {
    %c0_i32 = arith.constant 0 : i32
    %c0_i32_0 = arith.constant 0 : i32
    return %arg0, %c0_i32 : i32, i32
  }
  func.func @transform_8(%arg0: i32) -> (i32, i32) {
    %c0_i32 = arith.constant 0 : i32
    %c0_i32_0 = arith.constant 0 : i32
    return %arg0, %c0_i32 : i32, i32
  }
}

</mosaic_0001>

<bundles_post_ra>
// kernel: tpu_custom_call.1
= control target key start
LH: loop header
LB: loop body
LE: loop exit
PB: predicated region body
PF: predicated region fallthrough
CT: control target
= control target key end

     0   :  { %vm38_vm0 = vcmask 64512   ;;  %v407_v2 = vmov 0.0   ;;  %vm408_vm1 = vmmov 0   ;;  %v409_v5 = vmov 0.0|0.0   ;;  %s519_s0 = inlined_call_operand.vmem [shape: f32[8,16], index: 0, kind: input, shape index: {}]   ;;  %s520_s1 = inlined_call_operand.vmem [shape: f32[8,32], index: 1, kind: input, shape index: {}]   ;;  %s521_s2 = inlined_call_operand.vmem [shape: f32[1,32], index: 2, kind: input, shape index: {}]   ;;  %s522_s3 = inlined_call_operand.vmem [shape: f32[32,32], index: 3, kind: input, shape index: {}]   ;;  %s523_s4 = inlined_call_operand.vmem [shape: f32[1,32], index: 4, kind: input, shape index: {}]   ;;  %s524_s5 = inlined_call_operand.vmem [shape: f32[32,17], index: 5, kind: input, shape index: {}]   ;;  %s525_s6 = inlined_call_operand.vmem [shape: f32[1,17], index: 6, kind: input, shape index: {}]   ;;  %s526_s7 = inlined_call_operand.hbm [shape: f32[8,16], index: 7, kind: output, shape index: {0}]   ;;  %s527_s8 = inlined_call_operand.vmem [shape: f32[8,1], index: 8, kind: output, shape index: {1}]  }
   0x1   :  { %v30_v0 = vld [vmem:[%s520_s1] sm:$0xff]  ;;  %336 = vmatprep.subr.mxu0 %v407_v2  ;;  %338 = vmatprep.mubr.msk.f32.mxu0 %vm408_vm1, %v407_v2  ;;  %v114_v4 = vld [vmem:[%s522_s3 + $0x8] sm:$0xff] }
   0x2   :  { %v464_v1 = vld [vmem:[%s519_s0] sm:$0xff]  ;;  %337 = vmatpush3.msra.mxu0 %v30_v0  ;;  %363 = vmatprep.subr.bf16.mxu1 %v409_v5 }
   0x3   :  { %v113_v3 = vld [vmem:[%s522_s3] sm:$0xff] }
   0x4   :  { %v364_v6 = vpack.c.bf16 %v114_v4, %v113_v3 }
   0x5   :  { %14 = vsyncpa [#allocation3], 0  ;;  %339 = vmatmul.mubr.msk.f32.vlgmr.msra.gmra.mrb[0].mxu0 %vm38_vm0, %v464_v1  ;;  %349 = vmatprep.mubr.msk.f32.mxu1 %vm408_vm1, %v407_v2  ;;  %v115_v7 = vld [vmem:[%s522_s3 + $0x10] sm:$0xff]  ;;  %v116_v8 = vld [vmem:[%s522_s3 + $0x18] sm:$0xff]  ;;  %vm124_vm2 = vcmask 261120   ;;  %s411_s27 = smov 112  }
   0x6   :  { %365 = vmatpush3.bf16.msra.mxu1 %v364_v6  ;;  %369 = vmatprep.subr.bf16.mxu0 %v409_v5  ;;  %v367_v9 = vpack.c.bf16 %v116_v8, %v115_v7  ;;  %v199_v10 = vld [vmem:[%s524_s5] sm:$0xff]  ;;  %v200_v11 = vld [vmem:[%s524_s5 + $0x8] sm:$0xff]  ;;  %v201_v18 = vld [vmem:[%s524_s5 + $0x10] sm:$0xff]  ;;  %vm298_vm3 = vcmask 7168   ;;  %vm292_vm4 = vcmask 130048  }
   0x7   :  { %366 = vmatprep.subr.bf16.mxu1 %v409_v5  ;;  %360 = vmatprep.mubr.msk.f32.mxu0 %vm408_vm1, %v407_v2  ;;  %v370_v12 = vpack.c.bf16 %v200_v11, %v199_v10  ;;  %v318_v13 = vld [vmem:[%s521_s2] ss:$0 sm:$0xff]  ;;  %v202_v19 = vld [vmem:[%s524_s5 + $0x18] sm:$0xff]  ;;  %s410_s5 = smov 8  }
   0x8   :  { %v373_v20 = vpack.c.bf16 %v202_v19, %v201_v18  ;;  %v320_v21 = vld [vmem:[%s523_s4] ss:$0 sm:$0xff]  ;;  %s412_s4 = smov [#allocation2]  }
   0x9   :  { %371 = vmatpush3.bf16.msra.mxu0 %v370_v12  ;;  %v322_v26 = vld [vmem:[%s525_s6] ss:$0 sm:$0xff]  ;;  %s306_s28 = sshll.u32 %s412_s4, 4  ;;  %s307_s28 = int_to_ptr.vmem [resolvable:$true] %s306_s28 }
   0xa   :  { %368 = vmatpush3.bf16.msra.mxu1 %v367_v9  ;;  %372 = vmatprep.subr.bf16.mxu0 %v409_v5  ;;  %s383_s30 = scalar_lea.vmem %s307_s28, 128  ;;  %p388_p1 = scmp.lt.s32.totalorder %s307_s28, %s307_s28 }
   0xb   :  { %p384_p0 = scmp.ne.s32.totalorder %s307_s28, %s383_s30  ;;  %p389_p2 = scmp.lt.s32.totalorder %s383_s30, %s383_s30 }
   0xd   :  { %374 = vmatpush3.bf16.msra.mxu0 %v373_v20  ;;  %p390_p3 = por %p389_p2, %p388_p1 }
   0xf   :  { %p391_p4 = pnand %p390_p3, %p384_p0 }
  0xd8   :  { %v108_v14 = vpop.f32.mrb[0].mxu0 }
  0xd9   :  { %v109_v15 = vadd.f32 %v318_v13, %v108_v14  ;;  %v340_v16 = vpop.f32.mrb[1].mxu0 }
  0xdb   :  { %v112_v17 = vmax.f32 %v109_v15, 0.0 }
  0xdd   :  { %350 = vmatmul.mubr.msk.f32.vlgmr.msra.gmra.mrb[0].mxu1 %vm124_vm2, %v112_v17 }
 0x1b0   :  { %v194_v22 = vpop.f32.mrb[0].mxu1 }
 0x1b1   :  { %v195_v23 = vadd.f32 %v320_v21, %v194_v22  ;;  %v351_v24 = vpop.f32.mrb[1].mxu1 }
 0x1b3   :  { %v198_v25 = vmax.f32 %v195_v23, 0.0 }
 0x1b5   :  { %361 = vmatmul.mubr.msk.f32.vlgmr.msra.gmra.mrb[2].mxu0 %vm124_vm2, %v198_v25 }
 0x288   :  { %v279_v27 = vpop.f32.mrb[2].mxu0 }
 0x289   :  { %v280_v28 = vadd.f32 %v322_v26, %v279_v27  ;;  %v362_v29 = vpop.f32.mrb[3].mxu0 }
 0x28b   :  { %v283_v30 = vmul.f32 1.442695, %v280_v28 }
 0x28d   :  { %381 = vpow2.f32 %v283_v30 }
 0x297   :  { %v382_v31 = vpop.eup %381 }
 0x298   :  { %286 = vrot.lane.b32.xlu0 %v382_v31, %s410_s5 }
 0x29c   :  { %295 = vrot.lane.b32.xlu0 %v280_v28, %s411_s27 }
 0x30a   :  { %v287_v32 = vpop.permute.xlu0 %286 }
 0x30b   :  { %v289_v33 = vmul.f32 %v287_v32, %v464_v1 }
 0x30d   :  { %v290_v34 = vadd.f32 %v289_v33, %v280_v28 }
 0x30e   :  { %v296_v35 = vpop.permute.xlu0 %295 }
 0x30f   :  { %299 = vst.msk [vmem:[%s527_s8] sm:$0xff] %vm298_vm3, %v296_v35  ;;  %v291_v36 = vsel %vm38_vm0, %v464_v1, %v290_v34 }
 0x310   :  { %293 = vst.msk [vmem:[#allocation2] sm:$0xff] %vm292_vm4, %v291_v36 }
 0x311   :  { %394 = shalt.err (!%p391_p4)
}
 0x312   :  { %s395_s11 = scalar_lea.hbm %s526_s7, 128 }
 0x313   :  { %p396_p5 = scmp.ne.s32.totalorder %s526_s7, %s395_s11  ;;  %p399_p6 = scmp.lt.u32.totalorder %s395_s11, %s526_s7 }
 0x315   :  { %p401_p7 = pnand %p399_p6, %p396_p5 }
 0x317   :  { %404 = shalt.err (!%p401_p7)
}
 0x318   :  { %309 = dma.vmem_to_hbm [thread:$0]  %s307_s28, 128, %s526_s7, [#allocation3]  }
 0x319   :  { %405 = dma.done.wait [#allocation3], 128  }
 0x31a   :  { %406 = vsyncadd [#allocation3], 4294967168 }
 0x31b   :  { %317 = vsyncpa [#allocation3], 1 }

</bundles_post_ra>
